<compile_context>
chip_gen: v7x
topology: tpu7x:2x2x1
jax: 0.10.0
libtpu: 0.0.40
codegen_flags: <defaults>
</compile_context>

<pallas_src>
import functools

import jax
import jax.numpy as jnp
from jax import lax
from jax.experimental import pallas as pl
from jax.experimental.pallas import tpu as pltpu


# ----------------------------------------------------------------------------
# Static packing layout for the parameter buffer (shared by packer & kernel).
# ----------------------------------------------------------------------------
def _align8(n: int) -> int:
    return ((n + 7) // 8) * 8


def param_layout(obs_dim, h1, h2, act_dim):
    """Row offsets (8-aligned), total rows and cols of the packed buffer."""
    cols = max(obs_dim, h1, h2, act_dim)
    offs, r = {}, 0
    for name, rows in (("w1", h1), ("w2", h2), ("w3", act_dim),
                       ("sd", act_dim), ("b1", h1), ("b2", h2),
                       ("b3", act_dim)):
        offs[name] = r
        r += _align8(rows)
    return offs, r, cols


def pack_params(w1, b1, w2, b2, w3, b3, log_std):
    """Pack all parameters into one small VMEM-resident f32 buffer.

    Weights stay in PyTorch-native (out, in) layout; biases live in column 0
    of their row block; std is stored as diag(exp(log_std)) so the sampling
    term rides the MXU. Done ONCE at parameter-creation time (not per call).
    """
    h1, obs_dim = w1.shape
    h2 = w2.shape[0]
    a = w3.shape[0]
    offs, rows, cols = param_layout(obs_dim, h1, h2, a)
    std_diag = jnp.diag(jnp.exp(log_std.reshape(-1)))          # exp hoisted
    p = jnp.zeros((rows, cols), jnp.float32)
    p = p.at[offs["w1"]:offs["w1"] + h1, :obs_dim].set(w1)
    p = p.at[offs["w2"]:offs["w2"] + h2, :h1].set(w2)
    p = p.at[offs["w3"]:offs["w3"] + a, :h2].set(w3)
    p = p.at[offs["sd"]:offs["sd"] + a, :a].set(std_diag)
    p = p.at[offs["b1"]:offs["b1"] + h1, 0].set(b1.reshape(-1))
    p = p.at[offs["b2"]:offs["b2"] + h2, 0].set(b2.reshape(-1))
    p = p.at[offs["b3"]:offs["b3"] + a, 0].set(b3.reshape(-1))
    return p


# ----------------------------------------------------------------------------
# Pallas kernel: batch-major inputs, feature-major compute, lane-dense output.
#   obs_ref   : (TB, obs_dim)   batch-major tile
#   params_ref: (PR, PC)        packed parameters, VMEM-resident
#   noise_ref : (TB, A)         batch-major standard-normal noise tile
#   out_ref   : (2A, TB)        rows [0,A) = sampled action, [A,2A) = mean
# ----------------------------------------------------------------------------
def mlp_actor_kernel(obs_ref, params_ref, noise_ref, out_ref, *,
                     obs_dim, h1, h2, act_dim, offs):
    f32 = jnp.float32
    p = params_ref
    w1 = p[offs["w1"]:offs["w1"] + h1, :obs_dim]          # (H1, obs_dim)
    w2 = p[offs["w2"]:offs["w2"] + h2, :h1]               # (H2, H1)
    w3 = p[offs["w3"]:offs["w3"] + act_dim, :h2]          # (A,  H2)
    sd = p[offs["sd"]:offs["sd"] + act_dim, :act_dim]     # diag(std), (A, A)
    b1 = p[offs["b1"]:offs["b1"] + h1, 0:1]               # (H1, 1)
    b2 = p[offs["b2"]:offs["b2"] + h2, 0:1]               # (H2, 1)
    b3 = p[offs["b3"]:offs["b3"] + act_dim, 0:1]          # (A,  1)

    dn = (((1,), (1,)), ((), ()))   # contract last dim of both operands

    x_bm = obs_ref[...]                                   # (TB, obs_dim)
    # hidden 1: Linear + Tanh, feature-major (H1, TB); batch on the lane axis
    h = jnp.tanh(lax.dot_general(w1, x_bm, dn, preferred_element_type=f32) + b1)
    # hidden 2: Linear + Tanh -> (H2, TB)
    h = jnp.tanh(jnp.dot(w2, h, preferred_element_type=f32) + b2)
    # output layer: policy mean -> (A, TB)
    mean = jnp.dot(w3, h, preferred_element_type=f32) + b3
    # pi = Normal(mean, std);  a = mean + std * eps.
    # diag(std) @ eps^T done as one tiny MXU matmul (transposes & scales eps).
    act = mean + lax.dot_general(sd, noise_ref[...], dn,
                                 preferred_element_type=f32)

    # single merged, lane-dense output slab
    out_ref[0:act_dim, :] = act
    out_ref[act_dim:2 * act_dim, :] = mean


def mlp_actor_forward(obs, packed_params, noise, *, obs_dim, h1, h2, act_dim,
                      block_b=4096):
    """MLPActorContinuous.forward.

    obs:   (B, obs_dim) float32  (same layout the PyTorch module takes)
    noise: (B, act_dim) float32  standard-normal sampling noise
    Returns (action, mean), each (B, act_dim) float32.
    """
    B = obs.shape[0]
    offs, prows, pcols = param_layout(obs_dim, h1, h2, act_dim)

    # Batch tile: large (the kernel is per-step-overhead bound), lane-aligned,
    # capped for v7x's smaller VMEM, and sized so a large B always produces at
    # least 2 grid steps so v7x's two TensorCores can split the batch.
    block_b = min(max(128, (int(block_b) // 128) * 128), 65536)
    tile_b = max(128, min(block_b, pl.cdiv(B, 2 * 128) * 128))
    grid = (pl.cdiv(B, tile_b),)

    kernel = functools.partial(mlp_actor_kernel, obs_dim=obs_dim, h1=h1,
                               h2=h2, act_dim=act_dim, offs=offs)

    out = pl.pallas_call(
        kernel,
        out_shape=jax.ShapeDtypeStruct((2 * act_dim, B), jnp.float32),
        grid=grid,
        in_specs=[
            pl.BlockSpec((tile_b, obs_dim), lambda i: (i, 0)),   # obs (batch-major)
            pl.BlockSpec((prows, pcols), lambda i: (0, 0)),      # packed params (resident)
            pl.BlockSpec((tile_b, act_dim), lambda i: (i, 0)),   # noise (batch-major)
        ],
        out_specs=pl.BlockSpec((2 * act_dim, tile_b), lambda i: (0, i)),
        compiler_params=pltpu.CompilerParams(
            dimension_semantics=("parallel",)),
    )(obs, packed_params, noise)

    # split the merged slab and return in the module's (B, act_dim) layout
    action = out[:act_dim].T
    mean = out[act_dim:].T
    return action, mean


# ----------------------------------------------------------------------------
# Deterministic parameter initialization (mirrors init_weights in PyTorch).
# ----------------------------------------------------------------------------
def orthogonal_init(key, out_features, in_features, gain):
    rows, cols = out_features, in_features
    n, m = max(rows, cols), min(rows, cols)
    a = jax.random.normal(key, (n, m), dtype=jnp.float32)
    q, r = jnp.linalg.qr(a)
    q = q * jnp.sign(jnp.diag(r))[None, :]        # sign-fix for uniqueness
    w = q if rows >= cols else q.T                # (rows, cols) = (out, in)
    return (gain * w[:rows, :cols]).astype(jnp.float32)


def make_params(key, obs_dim, hidden_sizes, act_dim, log_std_init):
    k1, k2, k3 = jax.random.split(key, 3)
    h1, h2 = hidden_sizes
    g_hidden = jnp.sqrt(2.0)
    w1 = orthogonal_init(k1, h1, obs_dim, g_hidden)
    w2 = orthogonal_init(k2, h2, h1, g_hidden)
    w3 = orthogonal_init(k3, act_dim, h2, 0.01)   # output layer: gain 0.01
    b1 = jnp.zeros((h1,), jnp.float32)
    b2 = jnp.zeros((h2,), jnp.float32)
    b3 = jnp.zeros((act_dim,), jnp.float32)
    log_std = jnp.asarray(log_std_init, jnp.float32).reshape(act_dim)
    return (w1, b1, w2, b2, w3, b3, log_std)


def reference_forward(obs, raw_params, noise):
    w1, b1, w2, b2, w3, b3, log_std = raw_params
    h = jnp.tanh(obs @ w1.T + b1)
    h = jnp.tanh(h @ w2.T + b2)
    mean = h @ w3.T + b3
    act = mean + jnp.exp(log_std) * noise
    return act, mean


if __name__ == "__main__":
    # Module-consistent shapes: obs_dim=16, hidden_sizes=[32, 32], act_dim=8,
    # hidden_acts=Tanh, log_std_init=[-0.5]*act_dim.  B=250 exercises a
    # 2-step batch grid with a partial (garbage-but-discarded) tail block.
    B, OBS_DIM, HIDDEN, ACT_DIM = 250, 16, (32, 32), 8

    key = jax.random.PRNGKey(0)
    k_param, k_obs, k_noise = jax.random.split(key, 3)

    raw_params = make_params(k_param, OBS_DIM, HIDDEN, ACT_DIM,
                             [-0.5] * ACT_DIM)
    packed_params = pack_params(*raw_params)      # packed once, off hot path

    obs = jax.random.normal(k_obs, (B, OBS_DIM), dtype=jnp.float32)
    # torch.distributions.Normal.sample() noise, drawn here deterministically.
    noise = jax.random.normal(k_noise, (B, ACT_DIM), dtype=jnp.float32)

    fwd = jax.jit(functools.partial(
        mlp_actor_forward, obs_dim=OBS_DIM, h1=HIDDEN[0], h2=HIDDEN[1],
        act_dim=ACT_DIM))
    action, mean = fwd(obs, packed_params, noise)
    action = jax.block_until_ready(action)
    mean = jax.block_until_ready(mean)

    ref_action, ref_mean = reference_forward(obs, raw_params, noise)
    assert action.shape == (B, ACT_DIM) and mean.shape == (B, ACT_DIM)
    assert jnp.allclose(mean, ref_mean, atol=1e-5, rtol=1e-5)
    assert jnp.allclose(action, ref_action, atol=1e-5, rtol=1e-5)

    print("KERNEL_OK")
</pallas_src>

<mosaic_0001>
module attributes {stable_mosaic.version = 11 : i64} {
  func.func @mlp_actor_kernel(%arg0: i32, %arg1: memref<128x16xf32, #tpu.memory_space<vmem>>, %arg2: memref<152x32xf32, #tpu.memory_space<vmem>>, %arg3: memref<128x8xf32, #tpu.memory_space<vmem>>, %arg4: memref<16x128xf32, #tpu.memory_space<vmem>>) attributes {dimension_semantics = [#tpu.dimension_semantics<parallel>], iteration_bounds = array<i64: 2>, scalar_prefetch = 0 : i64, scratch_operands = 0 : i64, tpu.core_type = #tpu.core_type<tc>, window_params = [{transform_indices = @transform_0, window_bounds = array<i64: 128, 16>}, {pipeline_mode = #tpu.pipeline_mode<synchronous>, transform_indices = @transform_1, window_bounds = array<i64: 152, 32>}, {transform_indices = @transform_2, window_bounds = array<i64: 128, 8>}, {transform_indices = @transform_3, window_bounds = array<i64: 16, 128>}]} {
    %c0 = arith.constant 0 : index
    %c0_0 = arith.constant 0 : index
    %0 = vector.load %arg2[%c0, %c0_0] : memref<152x32xf32, #tpu.memory_space<vmem>>, vector<32x16xf32>
    %c32 = arith.constant 32 : index
    %c0_1 = arith.constant 0 : index
    %1 = vector.load %arg2[%c32, %c0_1] : memref<152x32xf32, #tpu.memory_space<vmem>>, vector<32x32xf32>
    %c64 = arith.constant 64 : index
    %c0_2 = arith.constant 0 : index
    %2 = vector.load %arg2[%c64, %c0_2] : memref<152x32xf32, #tpu.memory_space<vmem>>, vector<8x32xf32>
    %c72 = arith.constant 72 : index
    %c0_3 = arith.constant 0 : index
    %3 = vector.load %arg2[%c72, %c0_3] : memref<152x32xf32, #tpu.memory_space<vmem>>, vector<8x8xf32>
    %c80 = arith.constant 80 : index
    %c0_4 = arith.constant 0 : index
    %4 = vector.load %arg2[%c80, %c0_4] : memref<152x32xf32, #tpu.memory_space<vmem>>, vector<32x1xf32>
    %c112 = arith.constant 112 : index
    %c0_5 = arith.constant 0 : index
    %5 = vector.load %arg2[%c112, %c0_5] : memref<152x32xf32, #tpu.memory_space<vmem>>, vector<32x1xf32>
    %c144 = arith.constant 144 : index
    %c0_6 = arith.constant 0 : index
    %6 = vector.load %arg2[%c144, %c0_6] : memref<152x32xf32, #tpu.memory_space<vmem>>, vector<8x1xf32>
    %c0_7 = arith.constant 0 : index
    %c0_8 = arith.constant 0 : index
    %7 = vector.load %arg1[%c0_7, %c0_8] : memref<128x16xf32, #tpu.memory_space<vmem>>, vector<128x16xf32>
    %cst = arith.constant dense<0.000000e+00> : vector<32x128xf32>
    %8 = tpu.matmul %0, %7, %cst {dimension_numbers = #tpu.dot_dimension_numbers<[1], [1], [0], [0], [0, 0, 1, 0], [], []>} : vector<32x16xf32>, vector<128x16xf32>, vector<32x128xf32> -> vector<32x128xf32>
    %9 = vector.broadcast %4 : vector<32x1xf32> to vector<32x128xf32>
    %10 = arith.addf %8, %9 : vector<32x128xf32>
    %11 = math.tanh %10 : vector<32x128xf32>
    %cst_9 = arith.constant dense<0.000000e+00> : vector<32x128xf32>
    %12 = tpu.matmul %1, %11, %cst_9 {dimension_numbers = #tpu.dot_dimension_numbers<[1], [0], [0], [1], [0, 0, 1, 1], [], []>} : vector<32x32xf32>, vector<32x128xf32>, vector<32x128xf32> -> vector<32x128xf32>
    %13 = vector.broadcast %5 : vector<32x1xf32> to vector<32x128xf32>
    %14 = arith.addf %12, %13 : vector<32x128xf32>
    %15 = math.tanh %14 : vector<32x128xf32>
    %cst_10 = arith.constant dense<0.000000e+00> : vector<8x128xf32>
    %16 = tpu.matmul %2, %15, %cst_10 {dimension_numbers = #tpu.dot_dimension_numbers<[1], [0], [0], [1], [0, 0, 1, 1], [], []>} : vector<8x32xf32>, vector<32x128xf32>, vector<8x128xf32> -> vector<8x128xf32>
    %17 = vector.broadcast %6 : vector<8x1xf32> to vector<8x128xf32>
    %18 = arith.addf %16, %17 : vector<8x128xf32>
    %c0_11 = arith.constant 0 : index
    %c0_12 = arith.constant 0 : index
    %19 = vector.load %arg3[%c0_11, %c0_12] : memref<128x8xf32, #tpu.memory_space<vmem>>, vector<128x8xf32>
    %cst_13 = arith.constant dense<0.000000e+00> : vector<8x128xf32>
    %20 = tpu.matmul %3, %19, %cst_13 {dimension_numbers = #tpu.dot_dimension_numbers<[1], [1], [0], [0], [0, 0, 1, 0], [], []>} : vector<8x8xf32>, vector<128x8xf32>, vector<8x128xf32> -> vector<8x128xf32>
    %21 = arith.addf %18, %20 : vector<8x128xf32>
    %c0_14 = arith.constant 0 : index
    %c0_15 = arith.constant 0 : index
    %22 = vector.load %arg4[%c0_14, %c0_15] : memref<16x128xf32, #tpu.memory_space<vmem>>, vector<8x128xf32>
    tpu.vector_store %arg4[%c0_14, %c0_15], %21 {strides = array<i32>} : memref<16x128xf32, #tpu.memory_space<vmem>>, vector<8x128xf32>,
    %c8 = arith.constant 8 : index
    %c0_16 = arith.constant 0 : index
    %23 = vector.load %arg4[%c8, %c0_16] : memref<16x128xf32, #tpu.memory_space<vmem>>, vector<8x128xf32>
    tpu.vector_store %arg4[%c8, %c0_16], %18 {strides = array<i32>} : memref<16x128xf32, #tpu.memory_space<vmem>>, vector<8x128xf32>,
    return
  }
  func.func @transform_0(%arg0: i32) -> (i32, i32) {
    %c0_i32 = arith.constant 0 : i32
    %c0_i32_0 = arith.constant 0 : i32
    return %arg0, %c0_i32 : i32, i32
  }
  func.func @transform_1(%arg0: i32) -> (i32, i32) {
    %c0_i32 = arith.constant 0 : i32
    %c0_i32_0 = arith.constant 0 : i32
    %c0_i32_1 = arith.constant 0 : i32
    return %c0_i32, %c0_i32_0 : i32, i32
  }
  func.func @transform_2(%arg0: i32) -> (i32, i32) {
    %c0_i32 = arith.constant 0 : i32
    %c0_i32_0 = arith.constant 0 : i32
    return %arg0, %c0_i32 : i32, i32
  }
  func.func @transform_3(%arg0: i32) -> (i32, i32) {
    %c0_i32 = arith.constant 0 : i32
    %c0_i32_0 = arith.constant 0 : i32
    return %c0_i32, %arg0 : i32, i32
  }
}

</mosaic_0001>

<bundles_post_ra>
// kernel: mlp_actor_forward.1
= control target key start
LH: loop header
LB: loop body
LE: loop exit
PB: predicated region body
PF: predicated region fallthrough
CT: control target
= control target key end

     0   :  { %s1234_s12 = smov 0   ;;  %s1236_s13 = smov 0   ;;  %s1467_s0 = inlined_call_operand.vmem [shape: f32[250,16], index: 0, kind: input, shape index: {}]   ;;  %s1468_s1 = inlined_call_operand.vmem [shape: f32[152,32], index: 1, kind: input, shape index: {}]   ;;  %s1469_s2 = inlined_call_operand.vmem [shape: f32[250,8], index: 2, kind: input, shape index: {}]   ;;  %s1470_s3 = inlined_call_operand.vmem [shape: f32[16,250], index: 3, kind: output, shape index: {}]  }
   0x1   :  { %s1238_s14 = smov 0  }
   0x2 LB: > { %s1247_s15 = sadd.s32 4294967295, %s1208_s14   ;;  %s1249_s16 = sadd.s32 1, %s1208_s14   ;;  %s1208_s14 = sphi %s1238_s14, %s1478_s14   ;;  %s1204_s13 = sphi %s1236_s13, %s1477_s13   ;;  %s1200_s12 = sphi %s1234_s12, %s1476_s12  }
   0x3   : > { %s90_s17 = ssub.s32 %s1208_s14, %s1249_s16  ;;  %s93_s18 = sadd.s32 1, %s1204_s13 }
   0x4   : > { %p91_p0 = scmp.eq.s32.totalorder %s90_s17, 0  ;;  %p103_p1 = scmp.ne.s32.totalorder %s1204_s13, %s1200_s12 }
   0x5   : > { %p104_p2 = scmp.eq.s32.totalorder %s1247_s15, 1  ;;  %p846_p3 = scmp.ge.s32.totalorder %s1208_s14, 1 }
   0x6   : > { %s1257_s19 = scalar_select %p91_p0, %s1204_s13, %s93_s18  }
   0x7   : > { %p1259_p4 = por %p104_p2, %p103_p1  ;;  %p149_p5 = scmp.lt.s32.totalorder %s1208_s14, 3 }
   0x9   : > { %p150_p6 = pnand %p846_p3, %p149_p5 }
   0xa   : > { %s848_s21 = sshll.u32 (!%p150_p6), %s1247_s15, 4  ;;  %vm244_vm0 = vcmask (!%p150_p6), 130048   ;;  %v189_v0 = vld [vmem:[%s1468_s1] sm:$0xff] (!%p150_p6)  ;;  %v1210_v1 = vmov (!%p150_p6), 0   ;;  %v199_v2 = vld [vmem:[%s1468_s1 + $0x50] sm:$0xff] (!%p150_p6)  ;;  %v200_v4 = vld [vmem:[%s1468_s1 + $0x58] sm:$0xff] (!%p150_p6) }
   0xb   : > { %153 = sbr.rel (%p150_p6) target bundleno = 784 (0x310), region = 32  ;;  %p178_p7 = scmp.lt.s32.totalorder (!%p150_p6), %s848_s21, 31  ;;  %980 = vmatprep.mubr.msk.f32.mxu0 (!%p150_p6), %vm244_vm0, %v189_v0  ;;  %1168 = vset.pattern.permute.xlu0 (!%p150_p6), %v1210_v1  ;;  %v201_v3 = vld [vmem:[%s1468_s1 + $0x60] sm:$0xff] (!%p150_p6)  ;;  %v202_v5 = vld [vmem:[%s1468_s1 + $0x68] sm:$0xff] (!%p150_p6)  ;;  %vm1292_vm1 = vmpackc.low (!%p150_p6), %vm244_vm0, %vm244_vm0  ;;  %vm414_vm2 = vcmask (!%p150_p6), 261120   ;;  %v1211_v40 = vmov (!%p150_p6), 0.0|0.0  }
   0xc   : > { %226 = vperm.xlu0 (!%p150_p6), %1168, %v199_v2   ;;  %1169 = vset.pattern.permute.xlu1 (!%p150_p6), %v1210_v1  ;;  %v203_v7 = vld [vmem:[%s1468_s1 + $0x70] sm:$0xff] (!%p150_p6)  ;;  %v204_v13 = vld [vmem:[%s1468_s1 + $0x78] sm:$0xff] (!%p150_p6)  ;;  %v205_v15 = vld [vmem:[%s1468_s1 + $0x80] sm:$0xff] (!%p150_p6)  ;;  %vm610_vm3 = vcmask (!%p150_p6), 64512   ;;  %vm1212_vm5 = vmmov (!%p150_p6), 0   ;;  %s174_s26 = sand.u32 (!%p150_p6), 1, %s1200_s12  }
   0xd   : > { %236 = vperm.xlu1 (!%p150_p6), %1169, %v201_v3   ;;  %v206_v16 = vld [vmem:[%s1468_s1 + $0x88] sm:$0xff] (!%p150_p6)  ;;  %v207_v19 = vld [vmem:[%s1468_s1 + $0x90] sm:$0xff] (!%p150_p6)  ;;  %v192_v38 = vld [vmem:[%s1468_s1 + $0x18] sm:$0xff] (!%p150_p6)  ;;  %s847_s27 = sshll.u32 (!%p150_p6), %s174_s26, 4 }
   0xe   : > { %v190_v36 = vld [vmem:[%s1468_s1 + $0x8] sm:$0xff] (!%p150_p6)  ;;  %v191_v37 = vld [vmem:[%s1468_s1 + $0x10] sm:$0xff] (!%p150_p6)  ;;  %v193_v39 = vld [vmem:[%s1468_s1 + $0x20] sm:$0xff] (!%p150_p6)  ;;  %s176_s28 = scalar_lea.vmem (!%p150_p6), [#allocation2], %s847_s27 }
   0xf   : > { %994 = vmatprep.mubr.msk.f32.mxu1 (!%p150_p6), %vm414_vm2, %v193_v39  ;;  %v194_v59 = vld [vmem:[%s1468_s1 + $0x28] sm:$0xff] (!%p150_p6)  ;;  %v195_v60 = vld [vmem:[%s1468_s1 + $0x30] sm:$0xff] (!%p150_p6)  ;;  %v196_v63 = vld [vmem:[%s1468_s1 + $0x38] sm:$0xff] (!%p150_p6) }
  0x10   : > { %231 = vperm.xlu0 (!%p150_p6), %1168, %v200_v4   ;;  %vm1399_vm4 = vmpackc.low (!%p150_p6), %vm610_vm3, %vm610_vm3 }
  0x11   : > { %241 = vperm.xlu1 (!%p150_p6), %1169, %v202_v5  }
  0x12   : > { %s1480_s21 = smov (!%p178_p7, %s848_s21), 31  ;;  %s895_s29 = sshll.u32 (%p1259_p4), %s1247_s15, 3 }
  0x13   : > { %s849_s5 = sshll.u32 %s1480_s21, 3  ;;  %s743_s12 = scalar_lea.vmem (%p1259_p4), %s1470_s3, %s895_s29 }
  0x14   : > { %s1288_s8 = scalar_lea.vmem %s1467_s0, %s849_s5  ;;  %396 = vperm.xlu0 %1168, %v203_v7   ;;  %s1381_s10 = scalar_lea.vmem %s1469_s2, %s849_s5 }
  0x15   : > { %v208_v8 = vld [vmem:[%s1288_s8] sm:$0xff]  ;;  %v209_v9 = vld [vmem:[%s1288_s8 + $0x8] sm:$0xff]  ;;  %v210_v10 = vld [vmem:[%s1288_s8 + $0x10] sm:$0xff]  ;;  %401 = vperm.xlu1 %1169, %v204_v13  }
  0x16   : > { %v1046_v11 = vpack.c.bf16 %v209_v9, %v208_v8  ;;  %v211_v12 = vld [vmem:[%s1288_s8 + $0x18] sm:$0xff]  ;;  %v212_v17 = vld [vmem:[%s1288_s8 + $0x20] sm:$0xff]  ;;  %v213_v18 = vld [vmem:[%s1288_s8 + $0x28] sm:$0xff] }
  0x17   : > { %v1052_v14 = vpack.c.bf16 %v211_v12, %v210_v10  ;;  %v1058_v20 = vpack.c.bf16 %v213_v18, %v212_v17  ;;  %v214_v21 = vld [vmem:[%s1288_s8 + $0x30] sm:$0xff]  ;;  %v215_v22 = vld [vmem:[%s1288_s8 + $0x38] sm:$0xff]  ;;  %v216_v24 = vld [vmem:[%s1288_s8 + $0x40] sm:$0xff] }
  0x18   : > { %1048 = vmatprep.subr.msk.bf16.mxu0 %vm1292_vm1, %v1046_v11  ;;  %406 = vperm.xlu0 %1168, %v205_v15   ;;  %v1064_v23 = vpack.c.bf16 %v215_v22, %v214_v21  ;;  %v217_v25 = vld [vmem:[%s1288_s8 + $0x48] sm:$0xff]  ;;  %v218_v27 = vld [vmem:[%s1288_s8 + $0x50] sm:$0xff]  ;;  %v219_v28 = vld [vmem:[%s1288_s8 + $0x58] sm:$0xff] }
  0x19   : > { %1051 = vmatpush3.bf16.xpose.msk.msra.mxu0 %vm1292_vm1, %v1046_v11  ;;  %411 = vperm.xlu1 %1169, %v206_v16   ;;  %v1070_v26 = vpack.c.bf16 %v217_v25, %v216_v24  ;;  %v1076_v29 = vpack.c.bf16 %v219_v28, %v218_v27  ;;  %v220_v30 = vld [vmem:[%s1288_s8 + $0x60] sm:$0xff]  ;;  %v221_v31 = vld [vmem:[%s1288_s8 + $0x68] sm:$0xff]  ;;  %v222_v33 = vld [vmem:[%s1288_s8 + $0x70] sm:$0xff] }
  0x1a   : > { %1054 = vmatprep.subr.msk.bf16.mxu0 %vm1292_vm1, %v1052_v14  ;;  %v1082_v32 = vpack.c.bf16 %v221_v31, %v220_v30  ;;  %v223_v34 = vld [vmem:[%s1288_s8 + $0x78] sm:$0xff]  ;;  %v594_v61 = vld [vmem:[%s1381_s10] sm:$0xff]  ;;  %v595_v62 = vld [vmem:[%s1381_s10 + $0x8] sm:$0xff] }
  0x1b   : > { %v1088_v35 = vpack.c.bf16 %v223_v34, %v222_v33  ;;  %v1109_v0 = vpack.c.bf16 %v595_v62, %v594_v61  ;;  %v596_v2 = vld [vmem:[%s1381_s10 + $0x10] sm:$0xff]  ;;  %v597_v3 = vld [vmem:[%s1381_s10 + $0x18] sm:$0xff]  ;;  %v598_v5 = vld [vmem:[%s1381_s10 + $0x20] sm:$0xff] }
  0x1c   : > { %518 = vperm.xlu0 %1168, %v207_v19   ;;  %v1113_v4 = vpack.c.bf16 %v597_v3, %v596_v2  ;;  %v599_v6 = vld [vmem:[%s1381_s10 + $0x28] sm:$0xff]  ;;  %v600_v8 = vld [vmem:[%s1381_s10 + $0x30] sm:$0xff]  ;;  %v601_v9 = vld [vmem:[%s1381_s10 + $0x38] sm:$0xff] }
  0x1d   : > { %v1117_v7 = vpack.c.bf16 %v599_v6, %v598_v5  ;;  %v1121_v10 = vpack.c.bf16 %v601_v9, %v600_v8  ;;  %v602_v11 = vld [vmem:[%s1381_s10 + $0x40] sm:$0xff]  ;;  %v603_v12 = vld [vmem:[%s1381_s10 + $0x48] sm:$0xff]  ;;  %v605_v15 = vld [vmem:[%s1381_s10 + $0x58] sm:$0xff] }
  0x1e   : > { %v1125_v13 = vpack.c.bf16 %v603_v12, %v602_v11  ;;  %v606_v17 = vld [vmem:[%s1381_s10 + $0x60] sm:$0xff]  ;;  %v607_v18 = vld [vmem:[%s1381_s10 + $0x68] sm:$0xff]  ;;  %v609_v21 = vld [vmem:[%s1381_s10 + $0x78] sm:$0xff] }
  0x1f   : > { %v1133_v19 = vpack.c.bf16 %v607_v18, %v606_v17  ;;  %v198_v24 = vld [vmem:[%s1468_s1 + $0x48] sm:$0xff] }
  0x21   : > { %1057 = vmatpush3.bf16.xpose.msk.msra.mxu0 %vm1292_vm1, %v1052_v14  ;;  %v604_v14 = vld [vmem:[%s1381_s10 + $0x50] sm:$0xff] }
  0x22   : > { %1060 = vmatprep.subr.msk.bf16.mxu0 %vm1292_vm1, %v1058_v20  ;;  %v1129_v16 = vpack.c.bf16 %v605_v15, %v604_v14 }
  0x29   : > { %1063 = vmatpush3.bf16.xpose.msk.msra.mxu0 %vm1292_vm1, %v1058_v20  ;;  %v608_v20 = vld [vmem:[%s1381_s10 + $0x70] sm:$0xff] }
  0x2a   : > { %1066 = vmatprep.subr.msk.bf16.mxu0 %vm1292_vm1, %v1064_v23  ;;  %v1137_v22 = vpack.c.bf16 %v609_v21, %v608_v20 }
  0x31   : > { %1069 = vmatpush3.bf16.xpose.msk.msra.mxu0 %vm1292_vm1, %v1064_v23  ;;  %v1213_v23 = vmov 0.0  }
  0x32   : > { %1072 = vmatprep.subr.msk.bf16.mxu0 %vm1292_vm1, %v1070_v26 }
  0x39   : > { %1075 = vmatpush3.bf16.xpose.msk.msra.mxu0 %vm1292_vm1, %v1070_v26 }
  0x3a   : > { %1078 = vmatprep.subr.msk.bf16.mxu0 %vm1292_vm1, %v1076_v29 }
  0x41   : > { %1081 = vmatpush3.bf16.xpose.msk.msra.mxu0 %vm1292_vm1, %v1076_v29 }
  0x42   : > { %1084 = vmatprep.subr.msk.bf16.mxu0 %vm1292_vm1, %v1082_v32 }
  0x49   : > { %1087 = vmatpush3.bf16.xpose.msk.msra.mxu0 %vm1292_vm1, %v1082_v32 }
  0x4a   : > { %1090 = vmatprep.subr.msk.bf16.mxu0 %vm1292_vm1, %v1088_v35 }
  0x51   : > { %1093 = vmatpush3.bf16.xpose.msk.msra.mxu0 %vm1292_vm1, %v1088_v35 }
  0x52   : > { %1102 = vmatprep.subr.bf16.mxu0 %v1211_v40 }
  0x58   : > { %981 = vmatmul.mubr.msk.f32.vlgmr.msra.gmra.mrb[0].mxu0 %vm244_vm0, %v190_v36 }
  0x59   : > { %983 = vmatprep.mubr.msk.f32.mxu0 %vm244_vm0, %v191_v37 }
  0x5c   : > { %984 = vmatmul.mubr.msk.f32.gmra.mrb[2].mxu0 %vm244_vm0, %v192_v38 }
  0x5d   : > { %1008 = vmatprep.mubr.msk.f32.mxu0 %vm1212_vm5, %v1213_v23 }
  0x8b   : > { %v227_v41 = vpop.permute.xlu0 %226 }
  0x8c   : > { %v237_v42 = vpop.permute.xlu1 %236 }
  0x8f   : > { %v232_v43 = vpop.permute.xlu0 %231 }
  0x90   : > { %v242_v48 = vpop.permute.xlu1 %241 }
  0x93   : > { %v397_v26 = vpop.permute.xlu0 %396 }
  0x94   : > { %v402_v25 = vpop.permute.xlu1 %401 }
  0x97   : > { %v407_v33 = vpop.permute.xlu0 %406 }
  0x98   : > { %v412_v31 = vpop.permute.xlu1 %411 }
 0x12b   : > { %v982_v44 = vpop.f32.mrb[0].mxu0 }
 0x12c   : > { %v377_v45 = vadd.f32 %v982_v44, %v232_v43  ;;  %v371_v46 = vpop.f32.mrb[1].mxu0  ;;  %v197_v44 = vld [vmem:[%s1468_s1 + $0x40] sm:$0xff] }
 0x12d   : > { %v372_v47 = vadd.f32 %v371_v46, %v227_v41 }
 0x12e   : > { %1170 = vtanh.f32 %v377_v45 }
 0x12f   : > { %1172 = vtanh.f32 %v372_v47  ;;  %v985_v49 = vpop.f32.mrb[2].mxu0  ;;  %v519_v47 = vpop.permute.xlu0 %518 }
 0x130   : > { %v387_v50 = vadd.f32 %v985_v49, %v242_v48  ;;  %v381_v51 = vpop.f32.mrb[3].mxu0 }
 0x131   : > { %v382_v52 = vadd.f32 %v381_v51, %v237_v42 }
 0x132   : > { %1174 = vtanh.f32 %v387_v50 }
 0x133   : > { %1176 = vtanh.f32 %v382_v52 }
 0x138   : > { %v1171_v53 = vpop.eup %1170 }
 0x139   : > { %v1173_v54 = vpop.eup %1172 }
 0x13a   : > { %v1094_v55 = vpack.c.bf16 %v1171_v53, %v1173_v54 }
 0x13c   : > { %v1175_v56 = vpop.eup %1174  ;;  %1095 = vmatprep.subr.bf16.mxu1 %v1094_v55 }
 0x13d   : > { %v1177_v57 = vpop.eup %1176  ;;  %1097 = vmatpush3.bf16.msra.mxu1 %v1094_v55 }
 0x13e   : > { %v1098_v58 = vpack.c.bf16 %v1175_v56, %v1177_v57 }
 0x140   : > { %1099 = vmatprep.subr.bf16.mxu1 %v1098_v58 }
 0x141   : > { %1101 = vmatpush3.bf16.msra.mxu1 %v1098_v58 }
 0x142   : > { %1108 = vmatprep.subr.bf16.mxu1 %v1211_v40 }
 0x144   : > { %995 = vmatmul.mubr.msk.f32.vlgmr.msra.gmra.mrb[0].mxu1 %vm414_vm2, %v194_v59 }
 0x145   : > { %997 = vmatprep.mubr.msk.f32.mxu1 %vm414_vm2, %v195_v60 }
 0x148   : > { %998 = vmatmul.mubr.msk.f32.gmra.mrb[2].mxu1 %vm414_vm2, %v196_v63 }
 0x149   : > { %1043 = vmatprep.mubr.msk.f32.mxu1 %vm1212_vm5, %v1213_v23 }
 0x14a   : > { %1111 = vmatpush3.bf16.xpose.msk.msra.mxu1 %vm1399_vm4, %v1109_v0 }
 0x14b   : > { %1112 = vmatprep.subr.bf16.mxu1 %v1211_v40 }
 0x152   : > { %1115 = vmatpush3.bf16.xpose.msk.msra.mxu1 %vm1399_vm4, %v1113_v4 }
 0x153   : > { %1116 = vmatprep.subr.bf16.mxu1 %v1211_v40 }
 0x15a   : > { %1119 = vmatpush3.bf16.xpose.msk.msra.mxu1 %vm1399_vm4, %v1117_v7 }
 0x15b   : > { %1120 = vmatprep.subr.bf16.mxu1 %v1211_v40 }
 0x162   : > { %1123 = vmatpush3.bf16.xpose.msk.msra.mxu1 %vm1399_vm4, %v1121_v10 }
 0x163   : > { %1124 = vmatprep.subr.bf16.mxu1 %v1211_v40 }
 0x16a   : > { %1127 = vmatpush3.bf16.xpose.msk.msra.mxu1 %vm1399_vm4, %v1125_v13 }
 0x16b   : > { %1128 = vmatprep.subr.bf16.mxu1 %v1211_v40 }
 0x172   : > { %1131 = vmatpush3.bf16.xpose.msk.msra.mxu1 %vm1399_vm4, %v1129_v16 }
 0x173   : > { %1132 = vmatprep.subr.bf16.mxu1 %v1211_v40 }
 0x17a   : > { %1135 = vmatpush3.bf16.xpose.msk.msra.mxu1 %vm1399_vm4, %v1133_v19 }
 0x17b   : > { %1136 = vmatprep.subr.bf16.mxu1 %v1211_v40 }
 0x182   : > { %1139 = vmatpush3.bf16.xpose.msk.msra.mxu1 %vm1399_vm4, %v1137_v22 }
 0x189   : > { %1044 = vmatmul.mubr.msk.f32.vlgmr.msra.gmra.mrb[4].mxu1 %vm610_vm3, %v198_v24 }
 0x217   : > { %v996_v27 = vpop.f32.mrb[0].mxu1 }
 0x218   : > { %v499_v28 = vadd.f32 %v996_v27, %v402_v25  ;;  %v493_v29 = vpop.f32.mrb[1].mxu1 }
 0x219   : > { %v494_v30 = vadd.f32 %v493_v29, %v397_v26 }
 0x21a   : > { %1178 = vtanh.f32 %v499_v28 }
 0x21b   : > { %1180 = vtanh.f32 %v494_v30  ;;  %v999_v32 = vpop.f32.mrb[2].mxu1 }
 0x21c   : > { %v509_v34 = vadd.f32 %v999_v32, %v412_v31  ;;  %v503_v35 = vpop.f32.mrb[3].mxu1 }
 0x21d   : > { %v504_v36 = vadd.f32 %v503_v35, %v407_v33 }
 0x21e   : > { %1182 = vtanh.f32 %v509_v34 }
 0x21f   : > { %1184 = vtanh.f32 %v504_v36 }
 0x224   : > { %v1179_v37 = vpop.eup %1178 }
 0x225   : > { %v1181_v38 = vpop.eup %1180 }
 0x226   : > { %v1103_v39 = vpack.c.bf16 %v1179_v37, %v1181_v38 }
 0x228   : > { %v1183_v41 = vpop.eup %1182  ;;  %1104 = vmatpush3.bf16.msra.mxu0 %v1103_v39 }
 0x229   : > { %v1185_v42 = vpop.eup %1184  ;;  %1105 = vmatprep.subr.bf16.mxu0 %v1211_v40 }
 0x22a   : > { %v1106_v43 = vpack.c.bf16 %v1183_v41, %v1185_v42 }
 0x22c   : > { %1107 = vmatpush3.bf16.msra.mxu0 %v1106_v43 }
 0x22f   : > { %1009 = vmatmul.mubr.msk.f32.vlgmr.msra.gmra.mrb[4].mxu0 %vm414_vm2, %v197_v44 }
 0x25c   : > { %v728_v45 = vpop.f32.mrb[4].mxu1 }
 0x25d   : > { %v1045_v46 = vpop.f32.mrb[5].mxu1 }
 0x301   : > { %741 = sbr.rel (!%p1259_p4) target bundleno = 784 (0x310), region = 36 }
 0x302   : > { %v590_v48 = vpop.f32.mrb[4].mxu0 }
 0x303   : > { %v591_v49 = vadd.f32 %v590_v48, %v519_v47  ;;  %v1010_v50 = vpop.f32.mrb[5].mxu0 }
 0x305   : > { %734 = vst [vmem:[%s176_s28 + $0x8] sm:$0xff] %v591_v49  ;;  %v732_v51 = vadd.f32 %v728_v45, %v591_v49 }
 0x307   : > { %733 = vst [vmem:[%s176_s28] sm:$0xff] %v732_v51 }
 0x30c   : > { %v775_v52 = vld [vmem:[%s176_s28 + $0x8] sm:$0xff] }
 0x30d   : > { %776 = vst [vmem:[%s743_s12 + $0x10] sm:$0xff] %v775_v52 }
 0x30e   : > { %v773_v40 = vld [vmem:[%s176_s28] sm:$0xff] }
 0x30f   : > { %774 = vst [vmem:[%s743_s12] sm:$0xff] %v773_v40 }
 0x310 PF: > { %p10_p8 = scmp.ge.s32.totalorder %s1249_s16, 4   ;;  %s1476_s12 = smov %s1204_s13 }
 0x311   : > { %s1477_s13 = smov %s1257_s19  ;;  %s1478_s14 = smov %s1249_s16 }
 0x312   :  { %12 = sbr.rel (!%p10_p8) target bundleno = 2 (0x2), region = 103 }

</bundles_post_ra>
